<compile_context>
chip_gen: v7x
topology: tpu7x:2x2x1
jax: 0.10.0
libtpu: 0.0.40
codegen_flags: <defaults>
</compile_context>

<pallas_src>
import jax
import jax.numpy as jnp
from jax.experimental import pallas as pl
from jax.experimental.pallas import tpu as pltpu

# ---- model hyper-parameters (small, consistent with the module) -------------
B = 2          # batch
S = 8          # sequence length
H = 32         # hid_dim
N_HEADS = 4
HEAD_DIM = H // N_HEADS
PF = 64        # pf_dim
EPS = 1e-5     # nn.LayerNorm default eps
SCALE = float(HEAD_DIM) ** 0.5
BS = B * S


def encoder_layer_kernel(x_ref, wqkv_ref, bqkv_ref, wo_ref, bo_ref,
                         gamma_ref, beta_ref, w1_ref, b1_ref, w2_ref, b2_ref,
                         out_ref):
    # Single invocation: x_ref holds all B*S rows, (BS, H) f32, resident in VMEM.
    x = x_ref[...]

    # Hoisted parameter reads / broadcasts (JAX does not CSE broadcast_in_dim,
    # and layer_norm is applied twice).
    gamma = jnp.broadcast_to(gamma_ref[...], (BS, H))
    beta = jnp.broadcast_to(beta_ref[...], (BS, H))
    b_qkv = bqkv_ref[...]
    b_1 = b1_ref[...]
    b_2 = b2_ref[...]
    wo = wo_ref[...]

    # ---- fused QKV projection: one (BS, H) @ (H, 3H) matmul ----------------
    qkv = jnp.dot(x, wqkv_ref[...], preferred_element_type=jnp.float32) + b_qkv
    qkv3 = qkv.reshape(B, S, 3 * H)          # leading-dim split (layout no-op)

    # ---- multi-head self attention ------------------------------------------
    # Heads unrolled (4); batch handled as a leading einsum batch dim.  Each
    # head output is accumulated straight through its sublane slice of Wo, so
    # there is no lane concatenate of head outputs.
    inv_scale = 1.0 / SCALE
    attn_proj = jnp.broadcast_to(bo_ref[...], (BS, H))       # start from bias
    for h in range(N_HEADS):
        lo = h * HEAD_DIM
        qh = qkv3[:, :, lo:lo + HEAD_DIM]                    # (B, S, hd)
        kh = qkv3[:, :, H + lo:H + lo + HEAD_DIM]
        vh = qkv3[:, :, 2 * H + lo:2 * H + lo + HEAD_DIM]

        energy = jnp.einsum("bqd,bkd->bqk", qh, kh,
                            preferred_element_type=jnp.float32) * inv_scale
        energy = energy - jnp.max(energy, axis=-1, keepdims=True)
        p = jnp.exp(energy)
        attn = p * pl.reciprocal(jnp.sum(p, axis=-1, keepdims=True), approx=True)
        oh = jnp.einsum("bqk,bkd->bqd", attn, vh,
                        preferred_element_type=jnp.float32).reshape(BS, HEAD_DIM)
        attn_proj = attn_proj + jnp.dot(oh, wo[lo:lo + HEAD_DIM, :],
                                        preferred_element_type=jnp.float32)

    # ---- shared layer norm (single gamma/beta, used twice as in the module) --
    def layer_norm(val):
        mu = jnp.mean(val, axis=-1, keepdims=True)
        var = jnp.mean((val - mu) ** 2, axis=-1, keepdims=True)
        return (val - mu) * jax.lax.rsqrt(var + EPS) * gamma + beta

    src1 = layer_norm(x + attn_proj)

    # ---- position-wise feed forward ------------------------------------------
    h1 = jnp.dot(src1, w1_ref[...], preferred_element_type=jnp.float32) + b_1
    h1 = jnp.maximum(h1, 0.0)                                # relu
    ff = jnp.dot(h1, w2_ref[...], preferred_element_type=jnp.float32) + b_2

    out_ref[...] = layer_norm(src1 + ff)                     # single (BS,H) store


def encoder_layer(src, p):
    """src: (B, S, H) float32.  p: dict of params (Linear weights as (in, out))."""
    # Fuse the QKV projection weights/biases in the wrapper (one MXU push).
    wqkv = jnp.concatenate([p["wq"], p["wk"], p["wv"]], axis=1)   # (H, 3H)
    bqkv = jnp.concatenate([p["bq"], p["bk"], p["bv"]], axis=1)   # (1, 3H)
    x2 = src.reshape(BS, H)                  # all rows in one contiguous slab

    in_specs = [pl.BlockSpec(memory_space=pltpu.MemorySpace.VMEM)
                for _ in range(11)]
    out2 = pl.pallas_call(
        encoder_layer_kernel,
        out_shape=jax.ShapeDtypeStruct((BS, H), src.dtype),
        in_specs=in_specs,
        out_specs=pl.BlockSpec(memory_space=pltpu.MemorySpace.VMEM),
    )(x2, wqkv, bqkv, p["wo"], p["bo"], p["gamma"], p["beta"],
      p["w1"], p["b1"], p["w2"], p["b2"])
    return out2.reshape(B, S, H)


def init_params(key):
    """Deterministic parameter init.  Linear weights stored as (in, out)
    (i.e. already transposed relative to torch's (out, in))."""
    ks = jax.random.split(key, 12)
    scale = 0.05

    def lin(kw, kb, fan_in, fan_out):
        w = scale * jax.random.normal(kw, (fan_in, fan_out), jnp.float32)
        b = scale * jax.random.normal(kb, (1, fan_out), jnp.float32)
        return w, b

    wq, bq = lin(ks[0], ks[1], H, H)
    wk, bk = lin(ks[2], ks[3], H, H)
    wv, bv = lin(ks[4], ks[5], H, H)
    wo, bo = lin(ks[6], ks[7], H, H)
    w1, b1 = lin(ks[8], ks[9], H, PF)
    w2, b2 = lin(ks[10], ks[11], PF, H)
    gamma = jnp.ones((1, H), jnp.float32)
    beta = jnp.zeros((1, H), jnp.float32)
    return dict(wq=wq, bq=bq, wk=wk, bk=bk, wv=wv, bv=bv, wo=wo, bo=bo,
                gamma=gamma, beta=beta, w1=w1, b1=b1, w2=w2, b2=b2)


def encoder_layer_ref(src, p):
    """Pure-JAX reference mirroring the PyTorch forward (dropout = identity)."""
    def mha(x):
        q = x @ p["wq"] + p["bq"]
        k = x @ p["wk"] + p["bk"]
        v = x @ p["wv"] + p["bv"]

        def split(t):
            return t.reshape(B, S, N_HEADS, HEAD_DIM).transpose(0, 2, 1, 3)
        qh, kh, vh = split(q), split(k), split(v)
        energy = jnp.einsum("bhqd,bhkd->bhqk", qh, kh) / SCALE
        attn = jax.nn.softmax(energy, axis=-1)
        o = jnp.einsum("bhqk,bhkd->bhqd", attn, vh)
        o = o.transpose(0, 2, 1, 3).reshape(B, S, H)
        return o @ p["wo"] + p["bo"]

    def ln(x):
        mu = jnp.mean(x, axis=-1, keepdims=True)
        var = jnp.mean((x - mu) ** 2, axis=-1, keepdims=True)
        return (x - mu) * jax.lax.rsqrt(var + EPS) * p["gamma"] + p["beta"]

    def ffn(x):
        return jnp.maximum(x @ p["w1"] + p["b1"], 0.0) @ p["w2"] + p["b2"]

    src = ln(src + mha(src))
    src = ln(src + ffn(src))
    return src


if __name__ == "__main__":
    key = jax.random.PRNGKey(0)
    k_x, k_p = jax.random.split(key)
    src = jax.random.normal(k_x, (B, S, H), jnp.float32)
    params = init_params(k_p)

    out = encoder_layer(src, params)
    out = jax.block_until_ready(out)

    ref = encoder_layer_ref(src, params)
    assert out.shape == (B, S, H)
    # Tolerance slightly loosened (2e-3) because the softmax denominator uses
    # the EUP approximate reciprocal (pl.reciprocal(..., approx=True)).
    assert jnp.allclose(out, ref, atol=2e-3, rtol=2e-3), (
        float(jnp.max(jnp.abs(out - ref))))

    print("KERNEL_OK")
</pallas_src>

<mosaic_0001>
module attributes {stable_mosaic.version = 11 : i64} {
  func.func @encoder_layer_kernel(%arg0: memref<16x32xf32, #tpu.memory_space<vmem>>, %arg1: memref<32x96xf32, #tpu.memory_space<vmem>>, %arg2: memref<1x96xf32, #tpu.memory_space<vmem>>, %arg3: memref<32x32xf32, #tpu.memory_space<vmem>>, %arg4: memref<1x32xf32, #tpu.memory_space<vmem>>, %arg5: memref<1x32xf32, #tpu.memory_space<vmem>>, %arg6: memref<1x32xf32, #tpu.memory_space<vmem>>, %arg7: memref<32x64xf32, #tpu.memory_space<vmem>>, %arg8: memref<1x64xf32, #tpu.memory_space<vmem>>, %arg9: memref<64x32xf32, #tpu.memory_space<vmem>>, %arg10: memref<1x32xf32, #tpu.memory_space<vmem>>, %arg11: memref<16x32xf32, #tpu.memory_space<vmem>>) attributes {dimension_semantics = [], scalar_prefetch = 0 : i64, scratch_operands = 0 : i64, tpu.core_type = #tpu.core_type<tc>} {
    %c0 = arith.constant 0 : index
    %c0_0 = arith.constant 0 : index
    %0 = vector.load %arg0[%c0, %c0_0] : memref<16x32xf32, #tpu.memory_space<vmem>>, vector<16x32xf32>
    %c0_1 = arith.constant 0 : index
    %c0_2 = arith.constant 0 : index
    %1 = vector.load %arg5[%c0_1, %c0_2] : memref<1x32xf32, #tpu.memory_space<vmem>>, vector<1x32xf32>
    %2 = vector.shape_cast %1 : vector<1x32xf32> to vector<1x32xf32>
    %3 = vector.broadcast %2 : vector<1x32xf32> to vector<16x32xf32>
    %c0_3 = arith.constant 0 : index
    %c0_4 = arith.constant 0 : index
    %4 = vector.load %arg6[%c0_3, %c0_4] : memref<1x32xf32, #tpu.memory_space<vmem>>, vector<1x32xf32>
    %5 = vector.shape_cast %4 : vector<1x32xf32> to vector<1x32xf32>
    %6 = vector.broadcast %5 : vector<1x32xf32> to vector<16x32xf32>
    %c0_5 = arith.constant 0 : index
    %c0_6 = arith.constant 0 : index
    %7 = vector.load %arg2[%c0_5, %c0_6] : memref<1x96xf32, #tpu.memory_space<vmem>>, vector<1x96xf32>
    %c0_7 = arith.constant 0 : index
    %c0_8 = arith.constant 0 : index
    %8 = vector.load %arg8[%c0_7, %c0_8] : memref<1x64xf32, #tpu.memory_space<vmem>>, vector<1x64xf32>
    %c0_9 = arith.constant 0 : index
    %c0_10 = arith.constant 0 : index
    %9 = vector.load %arg10[%c0_9, %c0_10] : memref<1x32xf32, #tpu.memory_space<vmem>>, vector<1x32xf32>
    %c0_11 = arith.constant 0 : index
    %c0_12 = arith.constant 0 : index
    %10 = vector.load %arg3[%c0_11, %c0_12] : memref<32x32xf32, #tpu.memory_space<vmem>>, vector<32x32xf32>
    %c0_13 = arith.constant 0 : index
    %c0_14 = arith.constant 0 : index
    %11 = vector.load %arg1[%c0_13, %c0_14] : memref<32x96xf32, #tpu.memory_space<vmem>>, vector<32x96xf32>
    %cst = arith.constant dense<0.000000e+00> : vector<16x96xf32>
    %12 = tpu.matmul %0, %11, %cst {dimension_numbers = #tpu.dot_dimension_numbers<[1], [0], [0], [1], [0, 0, 1, 1], [], []>} : vector<16x32xf32>, vector<32x96xf32>, vector<16x96xf32> -> vector<16x96xf32>
    %13 = vector.broadcast %7 : vector<1x96xf32> to vector<16x96xf32>
    %14 = arith.addf %12, %13 : vector<16x96xf32>
    %15 = vector.shape_cast %14 : vector<16x96xf32> to vector<2x8x96xf32>
    %c0_15 = arith.constant 0 : index
    %c0_16 = arith.constant 0 : index
    %16 = vector.load %arg4[%c0_15, %c0_16] : memref<1x32xf32, #tpu.memory_space<vmem>>, vector<1x32xf32>
    %17 = vector.shape_cast %16 : vector<1x32xf32> to vector<1x32xf32>
    %18 = vector.broadcast %17 : vector<1x32xf32> to vector<16x32xf32>
    %19 = vector.extract_strided_slice %15 {offsets = [0, 0, 0], sizes = [2, 8, 8], strides = [1, 1, 1]} : vector<2x8x96xf32> to vector<2x8x8xf32>
    %20 = vector.extract_strided_slice %15 {offsets = [0, 0, 32], sizes = [2, 8, 8], strides = [1, 1, 1]} : vector<2x8x96xf32> to vector<2x8x8xf32>
    %21 = vector.extract_strided_slice %15 {offsets = [0, 0, 64], sizes = [2, 8, 8], strides = [1, 1, 1]} : vector<2x8x96xf32> to vector<2x8x8xf32>
    "tpu.trace_start"() <{level = 10 : i32, message = "bqd,bkd->bqk"}> : () -> ()
    %cst_17 = arith.constant dense<0.000000e+00> : vector<2x8x8xf32>
    %22 = tpu.matmul %19, %20, %cst_17 {dimension_numbers = #tpu.dot_dimension_numbers<[2], [2], [1], [1], [0, 0, 0, 1, 1, 1], [0], [0]>} : vector<2x8x8xf32>, vector<2x8x8xf32>, vector<2x8x8xf32> -> vector<2x8x8xf32>
    "tpu.trace_stop"() : () -> ()
    %cst_18 = arith.constant 0.353553385 : f32
    %23 = vector.broadcast %cst_18 : f32 to vector<2x8x8xf32>
    %24 = arith.mulf %22, %23 : vector<2x8x8xf32>
    %cst_19 = arith.constant dense<0xFF800000> : vector<2x8xf32>
    %25 = vector.multi_reduction <maximumf>, %24, %cst_19 [2] : vector<2x8x8xf32> to vector<2x8xf32>
    %26 = vector.shape_cast %25 : vector<2x8xf32> to vector<2x8x1xf32>
    %27 = vector.broadcast %26 : vector<2x8x1xf32> to vector<2x8x8xf32>
    %28 = arith.subf %24, %27 : vector<2x8x8xf32>
    %29 = math.exp %28 : vector<2x8x8xf32>
    %cst_20 = arith.constant dense<0.000000e+00> : vector<2x8xf32>
    %30 = vector.multi_reduction <add>, %29, %cst_20 [2] : vector<2x8x8xf32> to vector<2x8xf32>
    %31 = vector.shape_cast %30 : vector<2x8xf32> to vector<2x8x1xf32>
    %32 = tpu.reciprocal %31 {approx = true} : vector<2x8x1xf32> -> vector<2x8x1xf32>
    %33 = vector.broadcast %32 : vector<2x8x1xf32> to vector<2x8x8xf32>
    %34 = arith.mulf %29, %33 : vector<2x8x8xf32>
    "tpu.trace_start"() <{level = 10 : i32, message = "bqk,bkd->bqd"}> : () -> ()
    %cst_21 = arith.constant dense<0.000000e+00> : vector<2x8x8xf32>
    %35 = tpu.matmul %34, %21, %cst_21 {dimension_numbers = #tpu.dot_dimension_numbers<[2], [1], [1], [2], [0, 0, 0, 1, 1, 2], [0], [0]>} : vector<2x8x8xf32>, vector<2x8x8xf32>, vector<2x8x8xf32> -> vector<2x8x8xf32>
    "tpu.trace_stop"() : () -> ()
    %36 = vector.shape_cast %35 : vector<2x8x8xf32> to vector<16x8xf32>
    %37 = vector.extract_strided_slice %10 {offsets = [0, 0], sizes = [8, 32], strides = [1, 1]} : vector<32x32xf32> to vector<8x32xf32>
    %cst_22 = arith.constant dense<0.000000e+00> : vector<16x32xf32>
    %38 = tpu.matmul %36, %37, %cst_22 {dimension_numbers = #tpu.dot_dimension_numbers<[1], [0], [0], [1], [0, 0, 1, 1], [], []>} : vector<16x8xf32>, vector<8x32xf32>, vector<16x32xf32> -> vector<16x32xf32>
    %39 = arith.addf %18, %38 : vector<16x32xf32>
    %40 = vector.extract_strided_slice %15 {offsets = [0, 0, 8], sizes = [2, 8, 8], strides = [1, 1, 1]} : vector<2x8x96xf32> to vector<2x8x8xf32>
    %41 = vector.extract_strided_slice %15 {offsets = [0, 0, 40], sizes = [2, 8, 8], strides = [1, 1, 1]} : vector<2x8x96xf32> to vector<2x8x8xf32>
    %42 = vector.extract_strided_slice %15 {offsets = [0, 0, 72], sizes = [2, 8, 8], strides = [1, 1, 1]} : vector<2x8x96xf32> to vector<2x8x8xf32>
    "tpu.trace_start"() <{level = 10 : i32, message = "bqd,bkd->bqk"}> : () -> ()
    %cst_23 = arith.constant dense<0.000000e+00> : vector<2x8x8xf32>
    %43 = tpu.matmul %40, %41, %cst_23 {dimension_numbers = #tpu.dot_dimension_numbers<[2], [2], [1], [1], [0, 0, 0, 1, 1, 1], [0], [0]>} : vector<2x8x8xf32>, vector<2x8x8xf32>, vector<2x8x8xf32> -> vector<2x8x8xf32>
    "tpu.trace_stop"() : () -> ()
    %cst_24 = arith.constant 0.353553385 : f32
    %44 = vector.broadcast %cst_24 : f32 to vector<2x8x8xf32>
    %45 = arith.mulf %43, %44 : vector<2x8x8xf32>
    %cst_25 = arith.constant dense<0xFF800000> : vector<2x8xf32>
    %46 = vector.multi_reduction <maximumf>, %45, %cst_25 [2] : vector<2x8x8xf32> to vector<2x8xf32>
    %47 = vector.shape_cast %46 : vector<2x8xf32> to vector<2x8x1xf32>
    %48 = vector.broadcast %47 : vector<2x8x1xf32> to vector<2x8x8xf32>
    %49 = arith.subf %45, %48 : vector<2x8x8xf32>
    %50 = math.exp %49 : vector<2x8x8xf32>
    %cst_26 = arith.constant dense<0.000000e+00> : vector<2x8xf32>
    %51 = vector.multi_reduction <add>, %50, %cst_26 [2] : vector<2x8x8xf32> to vector<2x8xf32>
    %52 = vector.shape_cast %51 : vector<2x8xf32> to vector<2x8x1xf32>
    %53 = tpu.reciprocal %52 {approx = true} : vector<2x8x1xf32> -> vector<2x8x1xf32>
    %54 = vector.broadcast %53 : vector<2x8x1xf32> to vector<2x8x8xf32>
    %55 = arith.mulf %50, %54 : vector<2x8x8xf32>
    "tpu.trace_start"() <{level = 10 : i32, message = "bqk,bkd->bqd"}> : () -> ()
    %cst_27 = arith.constant dense<0.000000e+00> : vector<2x8x8xf32>
    %56 = tpu.matmul %55, %42, %cst_27 {dimension_numbers = #tpu.dot_dimension_numbers<[2], [1], [1], [2], [0, 0, 0, 1, 1, 2], [0], [0]>} : vector<2x8x8xf32>, vector<2x8x8xf32>, vector<2x8x8xf32> -> vector<2x8x8xf32>
    "tpu.trace_stop"() : () -> ()
    %57 = vector.shape_cast %56 : vector<2x8x8xf32> to vector<16x8xf32>
    %58 = vector.extract_strided_slice %10 {offsets = [8, 0], sizes = [8, 32], strides = [1, 1]} : vector<32x32xf32> to vector<8x32xf32>
    %cst_28 = arith.constant dense<0.000000e+00> : vector<16x32xf32>
    %59 = tpu.matmul %57, %58, %cst_28 {dimension_numbers = #tpu.dot_dimension_numbers<[1], [0], [0], [1], [0, 0, 1, 1], [], []>} : vector<16x8xf32>, vector<8x32xf32>, vector<16x32xf32> -> vector<16x32xf32>
    %60 = arith.addf %39, %59 : vector<16x32xf32>
    %61 = vector.extract_strided_slice %15 {offsets = [0, 0, 16], sizes = [2, 8, 8], strides = [1, 1, 1]} : vector<2x8x96xf32> to vector<2x8x8xf32>
    %62 = vector.extract_strided_slice %15 {offsets = [0, 0, 48], sizes = [2, 8, 8], strides = [1, 1, 1]} : vector<2x8x96xf32> to vector<2x8x8xf32>
    %63 = vector.extract_strided_slice %15 {offsets = [0, 0, 80], sizes = [2, 8, 8], strides = [1, 1, 1]} : vector<2x8x96xf32> to vector<2x8x8xf32>
    "tpu.trace_start"() <{level = 10 : i32, message = "bqd,bkd->bqk"}> : () -> ()
    %cst_29 = arith.constant dense<0.000000e+00> : vector<2x8x8xf32>
    %64 = tpu.matmul %61, %62, %cst_29 {dimension_numbers = #tpu.dot_dimension_numbers<[2], [2], [1], [1], [0, 0, 0, 1, 1, 1], [0], [0]>} : vector<2x8x8xf32>, vector<2x8x8xf32>, vector<2x8x8xf32> -> vector<2x8x8xf32>
    "tpu.trace_stop"() : () -> ()
    %cst_30 = arith.constant 0.353553385 : f32
    %65 = vector.broadcast %cst_30 : f32 to vector<2x8x8xf32>
    %66 = arith.mulf %64, %65 : vector<2x8x8xf32>
    %cst_31 = arith.constant dense<0xFF800000> : vector<2x8xf32>
    %67 = vector.multi_reduction <maximumf>, %66, %cst_31 [2] : vector<2x8x8xf32> to vector<2x8xf32>
    %68 = vector.shape_cast %67 : vector<2x8xf32> to vector<2x8x1xf32>
    %69 = vector.broadcast %68 : vector<2x8x1xf32> to vector<2x8x8xf32>
    %70 = arith.subf %66, %69 : vector<2x8x8xf32>
    %71 = math.exp %70 : vector<2x8x8xf32>
    %cst_32 = arith.constant dense<0.000000e+00> : vector<2x8xf32>
    %72 = vector.multi_reduction <add>, %71, %cst_32 [2] : vector<2x8x8xf32> to vector<2x8xf32>
    %73 = vector.shape_cast %72 : vector<2x8xf32> to vector<2x8x1xf32>
    %74 = tpu.reciprocal %73 {approx = true} : vector<2x8x1xf32> -> vector<2x8x1xf32>
    %75 = vector.broadcast %74 : vector<2x8x1xf32> to vector<2x8x8xf32>
    %76 = arith.mulf %71, %75 : vector<2x8x8xf32>
    "tpu.trace_start"() <{level = 10 : i32, message = "bqk,bkd->bqd"}> : () -> ()
    %cst_33 = arith.constant dense<0.000000e+00> : vector<2x8x8xf32>
    %77 = tpu.matmul %76, %63, %cst_33 {dimension_numbers = #tpu.dot_dimension_numbers<[2], [1], [1], [2], [0, 0, 0, 1, 1, 2], [0], [0]>} : vector<2x8x8xf32>, vector<2x8x8xf32>, vector<2x8x8xf32> -> vector<2x8x8xf32>
    "tpu.trace_stop"() : () -> ()
    %78 = vector.shape_cast %77 : vector<2x8x8xf32> to vector<16x8xf32>
    %79 = vector.extract_strided_slice %10 {offsets = [16, 0], sizes = [8, 32], strides = [1, 1]} : vector<32x32xf32> to vector<8x32xf32>
    %cst_34 = arith.constant dense<0.000000e+00> : vector<16x32xf32>
    %80 = tpu.matmul %78, %79, %cst_34 {dimension_numbers = #tpu.dot_dimension_numbers<[1], [0], [0], [1], [0, 0, 1, 1], [], []>} : vector<16x8xf32>, vector<8x32xf32>, vector<16x32xf32> -> vector<16x32xf32>
    %81 = arith.addf %60, %80 : vector<16x32xf32>
    %82 = vector.extract_strided_slice %15 {offsets = [0, 0, 24], sizes = [2, 8, 8], strides = [1, 1, 1]} : vector<2x8x96xf32> to vector<2x8x8xf32>
    %83 = vector.extract_strided_slice %15 {offsets = [0, 0, 56], sizes = [2, 8, 8], strides = [1, 1, 1]} : vector<2x8x96xf32> to vector<2x8x8xf32>
    %84 = vector.extract_strided_slice %15 {offsets = [0, 0, 88], sizes = [2, 8, 8], strides = [1, 1, 1]} : vector<2x8x96xf32> to vector<2x8x8xf32>
    "tpu.trace_start"() <{level = 10 : i32, message = "bqd,bkd->bqk"}> : () -> ()
    %cst_35 = arith.constant dense<0.000000e+00> : vector<2x8x8xf32>
    %85 = tpu.matmul %82, %83, %cst_35 {dimension_numbers = #tpu.dot_dimension_numbers<[2], [2], [1], [1], [0, 0, 0, 1, 1, 1], [0], [0]>} : vector<2x8x8xf32>, vector<2x8x8xf32>, vector<2x8x8xf32> -> vector<2x8x8xf32>
    "tpu.trace_stop"() : () -> ()
    %cst_36 = arith.constant 0.353553385 : f32
    %86 = vector.broadcast %cst_36 : f32 to vector<2x8x8xf32>
    %87 = arith.mulf %85, %86 : vector<2x8x8xf32>
    %cst_37 = arith.constant dense<0xFF800000> : vector<2x8xf32>
    %88 = vector.multi_reduction <maximumf>, %87, %cst_37 [2] : vector<2x8x8xf32> to vector<2x8xf32>
    %89 = vector.shape_cast %88 : vector<2x8xf32> to vector<2x8x1xf32>
    %90 = vector.broadcast %89 : vector<2x8x1xf32> to vector<2x8x8xf32>
    %91 = arith.subf %87, %90 : vector<2x8x8xf32>
    %92 = math.exp %91 : vector<2x8x8xf32>
    %cst_38 = arith.constant dense<0.000000e+00> : vector<2x8xf32>
    %93 = vector.multi_reduction <add>, %92, %cst_38 [2] : vector<2x8x8xf32> to vector<2x8xf32>
    %94 = vector.shape_cast %93 : vector<2x8xf32> to vector<2x8x1xf32>
    %95 = tpu.reciprocal %94 {approx = true} : vector<2x8x1xf32> -> vector<2x8x1xf32>
    %96 = vector.broadcast %95 : vector<2x8x1xf32> to vector<2x8x8xf32>
    %97 = arith.mulf %92, %96 : vector<2x8x8xf32>
    "tpu.trace_start"() <{level = 10 : i32, message = "bqk,bkd->bqd"}> : () -> ()
    %cst_39 = arith.constant dense<0.000000e+00> : vector<2x8x8xf32>
    %98 = tpu.matmul %97, %84, %cst_39 {dimension_numbers = #tpu.dot_dimension_numbers<[2], [1], [1], [2], [0, 0, 0, 1, 1, 2], [0], [0]>} : vector<2x8x8xf32>, vector<2x8x8xf32>, vector<2x8x8xf32> -> vector<2x8x8xf32>
    "tpu.trace_stop"() : () -> ()
    %99 = vector.shape_cast %98 : vector<2x8x8xf32> to vector<16x8xf32>
    %100 = vector.extract_strided_slice %10 {offsets = [24, 0], sizes = [8, 32], strides = [1, 1]} : vector<32x32xf32> to vector<8x32xf32>
    %cst_40 = arith.constant dense<0.000000e+00> : vector<16x32xf32>
    %101 = tpu.matmul %99, %100, %cst_40 {dimension_numbers = #tpu.dot_dimension_numbers<[1], [0], [0], [1], [0, 0, 1, 1], [], []>} : vector<16x8xf32>, vector<8x32xf32>, vector<16x32xf32> -> vector<16x32xf32>
    %102 = arith.addf %81, %101 : vector<16x32xf32>
    %103 = arith.addf %0, %102 : vector<16x32xf32>
    %cst_41 = arith.constant dense<0.000000e+00> : vector<16xf32>
    %104 = vector.multi_reduction <add>, %103, %cst_41 [1] : vector<16x32xf32> to vector<16xf32>
    %105 = vector.shape_cast %104 : vector<16xf32> to vector<16x1xf32>
    %cst_42 = arith.constant 3.200000e+01 : f32
    %106 = vector.broadcast %cst_42 : f32 to vector<16x1xf32>
    %107 = arith.divf %105, %106 : vector<16x1xf32>
    %108 = vector.broadcast %107 : vector<16x1xf32> to vector<16x32xf32>
    %109 = arith.subf %103, %108 : vector<16x32xf32>
    %110 = arith.mulf %109, %109 : vector<16x32xf32>
    %cst_43 = arith.constant dense<0.000000e+00> : vector<16xf32>
    %111 = vector.multi_reduction <add>, %110, %cst_43 [1] : vector<16x32xf32> to vector<16xf32>
    %112 = vector.shape_cast %111 : vector<16xf32> to vector<16x1xf32>
    %cst_44 = arith.constant 3.200000e+01 : f32
    %113 = vector.broadcast %cst_44 : f32 to vector<16x1xf32>
    %114 = arith.divf %112, %113 : vector<16x1xf32>
    %115 = vector.broadcast %107 : vector<16x1xf32> to vector<16x32xf32>
    %116 = arith.subf %103, %115 : vector<16x32xf32>
    %cst_45 = arith.constant 9.99999974E-6 : f32
    %117 = vector.broadcast %cst_45 : f32 to vector<16x1xf32>
    %118 = arith.addf %114, %117 : vector<16x1xf32>
    %119 = math.rsqrt %118 : vector<16x1xf32>
    %120 = vector.broadcast %119 : vector<16x1xf32> to vector<16x32xf32>
    %121 = arith.mulf %116, %120 : vector<16x32xf32>
    %122 = arith.mulf %121, %3 : vector<16x32xf32>
    %123 = arith.addf %122, %6 : vector<16x32xf32>
    %c0_46 = arith.constant 0 : index
    %c0_47 = arith.constant 0 : index
    %124 = vector.load %arg7[%c0_46, %c0_47] : memref<32x64xf32, #tpu.memory_space<vmem>>, vector<32x64xf32>
    %cst_48 = arith.constant dense<0.000000e+00> : vector<16x64xf32>
    %125 = tpu.matmul %123, %124, %cst_48 {dimension_numbers = #tpu.dot_dimension_numbers<[1], [0], [0], [1], [0, 0, 1, 1], [], []>} : vector<16x32xf32>, vector<32x64xf32>, vector<16x64xf32> -> vector<16x64xf32>
    %126 = vector.broadcast %8 : vector<1x64xf32> to vector<16x64xf32>
    %127 = arith.addf %125, %126 : vector<16x64xf32>
    %cst_49 = arith.constant 0.000000e+00 : f32
    %128 = vector.broadcast %cst_49 : f32 to vector<16x64xf32>
    %129 = arith.maximumf %127, %128 : vector<16x64xf32>
    %c0_50 = arith.constant 0 : index
    %c0_51 = arith.constant 0 : index
    %130 = vector.load %arg9[%c0_50, %c0_51] : memref<64x32xf32, #tpu.memory_space<vmem>>, vector<64x32xf32>
    %cst_52 = arith.constant dense<0.000000e+00> : vector<16x32xf32>
    %131 = tpu.matmul %129, %130, %cst_52 {dimension_numbers = #tpu.dot_dimension_numbers<[1], [0], [0], [1], [0, 0, 1, 1], [], []>} : vector<16x64xf32>, vector<64x32xf32>, vector<16x32xf32> -> vector<16x32xf32>
    %132 = vector.broadcast %9 : vector<1x32xf32> to vector<16x32xf32>
    %133 = arith.addf %131, %132 : vector<16x32xf32>
    %134 = arith.addf %123, %133 : vector<16x32xf32>
    %cst_53 = arith.constant dense<0.000000e+00> : vector<16xf32>
    %135 = vector.multi_reduction <add>, %134, %cst_53 [1] : vector<16x32xf32> to vector<16xf32>
    %136 = vector.shape_cast %135 : vector<16xf32> to vector<16x1xf32>
    %cst_54 = arith.constant 3.200000e+01 : f32
    %137 = vector.broadcast %cst_54 : f32 to vector<16x1xf32>
    %138 = arith.divf %136, %137 : vector<16x1xf32>
    %139 = vector.broadcast %138 : vector<16x1xf32> to vector<16x32xf32>
    %140 = arith.subf %134, %139 : vector<16x32xf32>
    %141 = arith.mulf %140, %140 : vector<16x32xf32>
    %cst_55 = arith.constant dense<0.000000e+00> : vector<16xf32>
    %142 = vector.multi_reduction <add>, %141, %cst_55 [1] : vector<16x32xf32> to vector<16xf32>
    %143 = vector.shape_cast %142 : vector<16xf32> to vector<16x1xf32>
    %cst_56 = arith.constant 3.200000e+01 : f32
    %144 = vector.broadcast %cst_56 : f32 to vector<16x1xf32>
    %145 = arith.divf %143, %144 : vector<16x1xf32>
    %146 = vector.broadcast %138 : vector<16x1xf32> to vector<16x32xf32>
    %147 = arith.subf %134, %146 : vector<16x32xf32>
    %cst_57 = arith.constant 9.99999974E-6 : f32
    %148 = vector.broadcast %cst_57 : f32 to vector<16x1xf32>
    %149 = arith.addf %145, %148 : vector<16x1xf32>
    %150 = math.rsqrt %149 : vector<16x1xf32>
    %151 = vector.broadcast %150 : vector<16x1xf32> to vector<16x32xf32>
    %152 = arith.mulf %147, %151 : vector<16x32xf32>
    %153 = arith.mulf %152, %3 : vector<16x32xf32>
    %154 = arith.addf %153, %6 : vector<16x32xf32>
    %c0_58 = arith.constant 0 : index
    %c0_59 = arith.constant 0 : index
    %155 = vector.load %arg11[%c0_58, %c0_59] : memref<16x32xf32, #tpu.memory_space<vmem>>, vector<16x32xf32>
    tpu.vector_store %arg11[%c0_58, %c0_59], %154 {strides = array<i32>} : memref<16x32xf32, #tpu.memory_space<vmem>>, vector<16x32xf32>,
    return
  }
}

</mosaic_0001>

<bundles_post_ra>
// kernel: tpu_custom_call.1
= control target key start
LH: loop header
LB: loop body
LE: loop exit
PB: predicated region body
PF: predicated region fallthrough
CT: control target
= control target key end

     0   :  { %16 = vsyncpa [#allocation3], 0  ;;  %s2993_s0 = inlined_call_operand.hbm [shape: f32[16,32], index: 0, kind: input, shape index: {}]   ;;  %s2994_s1 = inlined_call_operand.vmem [shape: f32[32,96], index: 1, kind: input, shape index: {}]   ;;  %s2995_s2 = inlined_call_operand.vmem [shape: f32[1,96], index: 2, kind: input, shape index: {}]   ;;  %s2996_s3 = inlined_call_operand.vmem [shape: f32[32,32], index: 3, kind: input, shape index: {}]   ;;  %s2997_s4 = inlined_call_operand.vmem [shape: f32[1,32], index: 4, kind: input, shape index: {}]   ;;  %s2998_s5 = inlined_call_operand.hbm [shape: f32[1,32], index: 5, kind: input, shape index: {}]   ;;  %s2999_s6 = inlined_call_operand.hbm [shape: f32[1,32], index: 6, kind: input, shape index: {}]   ;;  %s3000_s7 = inlined_call_operand.vmem [shape: f32[32,64], index: 7, kind: input, shape index: {}]   ;;  %s3001_s8 = inlined_call_operand.hbm [shape: f32[1,64], index: 8, kind: input, shape index: {}]   ;;  %s3002_s9 = inlined_call_operand.vmem [shape: f32[64,32], index: 9, kind: input, shape index: {}]   ;;  %s3003_s10 = inlined_call_operand.vmem [shape: f32[1,32], index: 10, kind: input, shape index: {}]   ;;  %s3004_s11 = inlined_call_operand.hbm [shape: f32[16,32], index: 11, kind: output, shape index: {}]  }
   0x1   :  { %17 = vsyncpa [#allocation6], 0 }
   0x2   :  { %18 = vsyncpa [#allocation9], 0 }
   0x3   :  { %19 = vsyncpa [#allocation4], 0  ;;  %s2613_s17 = smov [#allocation5]   ;;  %s2614_s19 = smov [#allocation2]  }
   0x4   :  { %s46_s18 = sshll.u32 %s2613_s17, 4  ;;  %s25_s20 = sshll.u32 %s2614_s19, 4  ;;  %s47_s18 = int_to_ptr.vmem [resolvable:$true] %s46_s18  ;;  %s2693_s20 = int_to_ptr.vmem [resolvable:$true] %s25_s20 }
   0x5   :  { %s2495_s23 = scalar_lea.hbm %s2998_s5, 16 }
   0x6   :  { %p2496_p0 = scmp.ne.s32.totalorder %s2998_s5, %s2495_s23  ;;  %p2499_p1 = scmp.lt.u32.totalorder %s2495_s23, %s2998_s5 }
   0x8   :  { %p2501_p2 = pnand %p2499_p1, %p2496_p0 }
   0xa   :  { %2504 = shalt.err (!%p2501_p2)
}
   0xb   :  { %s2505_s28 = scalar_lea.vmem %s47_s18, 16  ;;  %s2509_s29 = scalar_lea.vmem %s47_s18, 32 }
   0xc   :  { %p2506_p3 = scmp.ne.s32.totalorder %s47_s18, %s2505_s28  ;;  %p2510_p4 = scmp.lt.s32.totalorder %s47_s18, %s47_s18 }
   0xd   :  { %p2511_p5 = scmp.lt.s32.totalorder %s2509_s29, %s2505_s28 }
   0xf   :  { %p2512_p6 = por %p2511_p5, %p2510_p4 }
  0x11   :  { %p2513_p7 = pnand %p2512_p6, %p2506_p3 }
  0x13   :  { %2516 = shalt.err (!%p2513_p7)
}
  0x14   :  { %49 = dma.hbm_to_vmem [thread:$0]  %s2998_s5, 16, %s47_s18, [#allocation6]  }
  0x15   :  { %s2517_s15 = scalar_lea.hbm %s2993_s0, 256 }
  0x16   :  { %p2518_p8 = scmp.ne.s32.totalorder %s2993_s0, %s2517_s15  ;;  %p2521_p9 = scmp.lt.u32.totalorder %s2517_s15, %s2993_s0 }
  0x18   :  { %p2523_p10 = pnand %p2521_p9, %p2518_p8 }
  0x1a   :  { %2526 = shalt.err (!%p2523_p10)
}
  0x1b   :  { %s2527_s22 = scalar_lea.vmem %s2693_s20, 256  ;;  %p2532_p12 = scmp.lt.s32.totalorder %s2693_s20, %s2693_s20 }
  0x1c   :  { %p2528_p11 = scmp.ne.s32.totalorder %s2693_s20, %s2527_s22  ;;  %p2533_p13 = scmp.lt.s32.totalorder %s2527_s22, %s2527_s22 }
  0x1e   :  { %p2534_p0 = por %p2533_p13, %p2532_p12 }
  0x20   :  { %p2535_p1 = pnand %p2534_p0, %p2528_p11 }
  0x22   :  { %2538 = shalt.err (!%p2535_p1)
}
  0x23   :  { %s2615_s5 = smov 128   ;;  %s2616_s18 = smov 8  }
  0x24   :  { %31 = dma.hbm_to_vmem [thread:$0]  %s2993_s0, 256, %s2693_s20, [#allocation3], %s2615_s5, %s2615_s5, %s2616_s18  }
  0x25   :  { %s2617_s25 = smov [#allocation7]   ;;  %s2618_s27 = smov [#allocation8]  }
  0x26   :  { %s56_s26 = sshll.u32 %s2617_s25, 4  ;;  %s68_s28 = sshll.u32 %s2618_s27, 4  ;;  %s57_s26 = int_to_ptr.vmem [resolvable:$true] %s56_s26  ;;  %s69_s28 = int_to_ptr.vmem [resolvable:$true] %s68_s28 }
  0x27   :  { %s2539_s12 = scalar_lea.hbm %s2999_s6, 16 }
  0x28   :  { %p2540_p2 = scmp.ne.s32.totalorder %s2999_s6, %s2539_s12  ;;  %p2543_p3 = scmp.lt.u32.totalorder %s2539_s12, %s2999_s6 }
  0x2a   :  { %p2545_p4 = pnand %p2543_p3, %p2540_p2 }
  0x2c   :  { %2548 = shalt.err (!%p2545_p4)
}
  0x2d   :  { %s2549_s0 = scalar_lea.vmem %s57_s26, 16  ;;  %s2553_s20 = scalar_lea.vmem %s57_s26, 32 }
  0x2e   :  { %p2550_p5 = scmp.ne.s32.totalorder %s57_s26, %s2549_s0  ;;  %p2554_p6 = scmp.lt.s32.totalorder %s57_s26, %s57_s26 }
  0x2f   :  { %p2555_p7 = scmp.lt.s32.totalorder %s2553_s20, %s2549_s0 }
  0x31   :  { %p2556_p8 = por %p2555_p7, %p2554_p6 }
  0x33   :  { %p2557_p9 = pnand %p2556_p8, %p2550_p5 }
  0x35   :  { %2560 = shalt.err (!%p2557_p9)
}
  0x36   :  { %59 = dma.hbm_to_vmem [thread:$0]  %s2999_s6, 16, %s57_s26, [#allocation6]  }
  0x37   :  { %s2561_s23 = scalar_lea.hbm %s3001_s8, 16 }
  0x38   :  { %p2562_p10 = scmp.ne.s32.totalorder %s3001_s8, %s2561_s23  ;;  %p2565_p11 = scmp.lt.u32.totalorder %s2561_s23, %s3001_s8 }
  0x3a   :  { %p2567_p12 = pnand %p2565_p11, %p2562_p10 }
  0x3c   :  { %2570 = shalt.err (!%p2567_p12)
}
  0x3d   :  { %s2571_s30 = scalar_lea.vmem %s69_s28, 16  ;;  %s2575_s12 = scalar_lea.vmem %s69_s28, 32 }
  0x3e   :  { %p2572_p13 = scmp.ne.s32.totalorder %s69_s28, %s2571_s30  ;;  %p2576_p0 = scmp.lt.s32.totalorder %s69_s28, %s69_s28 }
  0x3f   :  { %p2577_p1 = scmp.lt.s32.totalorder %s2575_s12, %s2571_s30 }
  0x41   :  { %p2578_p2 = por %p2577_p1, %p2576_p0 }
  0x43   :  { %p2579_p3 = pnand %p2578_p2, %p2572_p13 }
  0x45   :  { %2582 = shalt.err (!%p2579_p3)
}
  0x46   :  { %71 = dma.hbm_to_vmem [thread:$0]  %s3001_s8, 16, %s69_s28, [#allocation9]  }
  0x47   :  { %2605 = dma.done.wait [#allocation3], 256  }
  0x48   :  { %2606 = vsyncadd [#allocation3], 4294967040 }
  0x49   :  { %2607 = dma.done.wait [#allocation6], 32  }
  0x4a   :  { %2608 = vsyncadd [#allocation6], 4294967264 }
  0x4b   :  { %2609 = dma.done.wait [#allocation9], 16  }
  0x4c   :  { %2610 = vsyncadd [#allocation9], 4294967280  ;;  %vm121_vm0 = vcmask 261120   ;;  %v111_v0 = vld [vmem:[%s2994_s1] sm:$0xff]  ;;  %v112_v1 = vld [vmem:[%s2994_s1 + $0x8] sm:$0xff]  ;;  %v2619_v8 = vmov 0.0  }
  0x4d   :  { %v113_v2 = vld [vmem:[%s2994_s1 + $0x10] sm:$0xff]  ;;  %v2395_v3 = vpack.c.bf16 %v112_v1, %v111_v0  ;;  %v114_v4 = vld [vmem:[%s2994_s1 + $0x18] sm:$0xff]  ;;  %v2763_v5 = vld [vmem:[#allocation2] sm:$0xff]  ;;  %2275 = vmatprep.subr.mxu0 %v2619_v8  ;;  %vm2620_vm1 = vmmov 0   ;;  %s2621_s19 = smov 96   ;;  %vm213_vm2 = vcmask 64512  }
  0x4e   :  { %v2399_v6 = vpack.c.bf16 %v114_v4, %v113_v2  ;;  %2262 = vmatprep.mubr.msk.f32.mxu1 %vm121_vm0, %v2763_v5  ;;  %v2767_v7 = vld [vmem:[#allocation2 + $0x8] sm:$0xff]  ;;  %2277 = vmatprep.mubr.msk.f32.mxu0 %vm2620_vm1, %v2619_v8  ;;  %v2146_v9 = vld [vmem:[%s2995_s2] ss:$0 sm:$0xff]  ;;  %s2622_s2 = smov 64   ;;  %s2623_s21 = smov 88   ;;  %vm2009_vm3 = vcmask 523264  }
  0x4f   :  { %2396 = vmatprep.subr.bf16.mxu1 %v2395_v3  ;;  %s2624_s22 = smov 120   ;;  %v107_v35 = vld [vmem:[%s2996_s3] sm:$0xff]  ;;  %s2625_s25 = smov 56  }
  0x50   :  { %2398 = vmatpush3.bf16.msra.mxu1 %v2395_v3  ;;  %s2626_s27 = smov 112   ;;  %s2627_s29 = smov 80  }
  0x51   :  { %2400 = vmatprep.subr.bf16.mxu1 %v2399_v6  ;;  %s2628_s30 = smov 48   ;;  %s2629_s12 = smov 72  }
  0x52   :  { %s2630_s6 = smov 104   ;;  %s2631_s16 = smov 40  }
  0x54   :  { %2402 = vmatpush3.bf16.msra.mxu1 %v2399_v6 }
  0x55   :  { %2265 = vmatprep.subr.mxu1 %v2619_v8 }
  0x57   :  { %2263 = vmatmul.mubr.msk.f32.vlgmr.msra.gmra.mrb[0].mxu1 %vm121_vm0, %v2767_v7 }
  0x58   :  { %2267 = vmatprep.mubr.msk.f32.mxu1 %vm2620_vm1, %v2619_v8 }
 0x12a   :  { %v2264_v10 = vpop.f32.mrb[0].mxu1 }
 0x12b   :  { %v194_v11 = vpop.f32.mrb[1].mxu1  ;;  %v2783_v13 = vadd.f32 %v2264_v10, %v2146_v9 }
 0x12c   :  { %v2780_v12 = vadd.f32 %v2146_v9, %v194_v11 }
 0x12e   :  { %211 = vrot.lane.b32.xlu0 %v2780_v12, %s2621_s19 }
 0x132   :  { %289 = vrot.lane.b32.xlu0 %v2783_v13, %s2621_s19 }
 0x1a0   :  { %v212_v14 = vpop.permute.xlu0 %211 }
 0x1a1   :  { %2266 = vmatpush3.xpose.msk.msra.mxu1 %vm213_vm2, %v212_v14 }
 0x1a2   :  { %2270 = vmatprep.subr.mxu1 %v2619_v8 }
 0x1a4   :  { %2268 = vmatmul.mubr.msk.f32.vlgmr.msra.gmra.mrb[2].mxu1 %vm213_vm2, %v2780_v12  ;;  %v290_v15 = vpop.permute.xlu0 %289 }
 0x1a5   :  { %2271 = vmatpush3.xpose.msk.msra.mxu1 %vm213_vm2, %v290_v15  ;;  %2272 = vmatprep.mubr.msk.f32.mxu1 %vm2620_vm1, %v2619_v8 }
 0x1a6   :  { %2280 = vmatprep.subr.mxu1 %v2619_v8 }
 0x1a8   :  { %2273 = vmatmul.mubr.msk.f32.vlgmr.msra.gmra.mrb[4].mxu1 %vm213_vm2, %v2783_v13 }
 0x1a9   :  { %2282 = vmatprep.mubr.msk.f32.mxu1 %vm2620_vm1, %v2619_v8 }
 0x277   :  { %v284_v16 = vpop.f32.mrb[2].mxu1 }
 0x278   :  { %v365_v17 = vmul.f32 0.35355338, %v284_v16  ;;  %v2269_v18 = vpop.f32.mrb[3].mxu1 }
 0x27a   :  { %v367_v19 = vsel %vm213_vm2, %v365_v17, -inf }
 0x27b   :  { %368 = vmax.xlane.f32.xlu1 %v367_v19  ;;  %v361_v20 = vpop.f32.mrb[4].mxu1 }
 0x27c   :  { %v366_v21 = vmul.f32 0.35355338, %v361_v20  ;;  %v2274_v22 = vpop.f32.mrb[5].mxu1 }
 0x27e   :  { %v370_v23 = vsel %vm213_vm2, %v366_v21, -inf }
 0x27f   :  { %371 = vmax.xlane.f32.xlu1 %v370_v23 }
 0x290   :  { %389 = vrot.lane.b32.xlu1 %v2780_v12, %s2622_s2 }
 0x308   :  { %v369_v24 = vpop.xlane.xlu1 %368 }
 0x309   :  { %v373_v25 = vsub.f32 %v365_v17, %v369_v24 }
 0x30b   :  { %v375_v26 = vmul.f32 1.442695, %v373_v25 }
 0x30c   :  { %v372_v27 = vpop.xlane.xlu1 %371 }
 0x30d   :  { %2455 = vpow2.f32 %v375_v26  ;;  %v374_v28 = vsub.f32 %v366_v21, %v372_v27 }
 0x30f   :  { %v377_v29 = vmul.f32 1.442695, %v374_v28 }
 0x310   :  { %v390_v30 = vpop.permute.xlu1 %389 }
 0x311   :  { %2457 = vpow2.f32 %v377_v29  ;;  %2276 = vmatpush3.msra.mxu0 %v390_v30 }
 0x312   :  { %2285 = vmatprep.subr.mxu0 %v107_v35 }
 0x317   :  { %v2456_v31 = vpop.eup %2455 }
 0x318   :  { %v379_v32 = vsel %vm213_vm2, %v2456_v31, 0.0 }
 0x319   :  { %380 = vadd.xlane.f32.xlu0 %v379_v32 }
 0x31b   :  { %v2458_v33 = vpop.eup %2457 }
 0x31c   :  { %v382_v34 = vsel %vm213_vm2, %v2458_v33, 0.0 }
 0x31d   :  { %383 = vadd.xlane.f32.xlu1 %v382_v34 }
 0x32e   :  { %465 = vrot.lane.b32.xlu1 %v2783_v13, %s2622_s2 }
 0x32f   :  { %704 = vrot.lane.b32.xlu0 %v2783_v13, %s2623_s21 }
 0x332   :  { %626 = vrot.lane.b32.xlu1 %v2780_v12, %s2623_s21 }
 0x336   :  { %624 = vrot.lane.b32.xlu1 %v2780_v12, %s2624_s22 }
 0x33a   :  { %702 = vrot.lane.b32.xlu1 %v2783_v13, %s2624_s22 }
 0x3a6   :  { %v381_v36 = vpop.xlane.xlu0 %380 }
 0x3a7   :  { %2459 = vrcp.f32 %v381_v36 }
 0x3aa   :  { %v384_v37 = vpop.xlane.xlu1 %383  ;;  %v705_v48 = vpop.permute.xlu0 %704 }
 0x3ab   :  { %2461 = vrcp.f32 %v384_v37 }
 0x3ae   :  { %v466_v38 = vpop.permute.xlu1 %465 }
 0x3af   :  { %2281 = vmatpush3.msra.mxu1 %v466_v38 }
 0x3b0   :  { %2290 = vmatprep.subr.mxu1 %v2619_v8 }
 0x3b1   :  { %v2460_v39 = vpop.eup %2459 }
 0x3b2   :  { %v387_v40 = vmul.f32 %v2460_v39, %v2456_v31  ;;  %v627_v42 = vpop.permute.xlu1 %626 }
 0x3b4   :  { %2278 = vmatmul.mubr.msk.f32.vlgmr.msra.gmra.mrb[0].mxu0 %vm213_vm2, %v387_v40 }
 0x3b5   :  { %v2462_v41 = vpop.eup %2461  ;;  %2286 = vmatpush3.msra.mxu0 %v107_v35 }
 0x3b6   :  { %v388_v43 = vmul.f32 %v2462_v41, %v2458_v33  ;;  %2295 = vmatprep.subr.mxu0 %v2619_v8  ;;  %v625_v44 = vpop.permute.xlu1 %624  ;;  %v108_v33 = vld [vmem:[%s2996_s3 + $0x8] sm:$0xff] }
 0x3b8   :  { %2283 = vmatmul.mubr.msk.f32.vlgmr.msra.gmra.mrb[6].mxu1 %vm213_vm2, %v388_v43 }
 0x3b9   :  { %2291 = vmatpush3.xpose.msk.msra.mxu1 %vm213_vm2, %v627_v42  ;;  %2292 = vmatprep.mubr.msk.f32.mxu1 %vm2620_vm1, %v2619_v8 }
 0x3ba   :  { %2300 = vmatprep.subr.mxu1 %v2619_v8  ;;  %v703_v50 = vpop.permute.xlu1 %702 }
 0x3bc   :  { %2293 = vmatmul.mubr.msk.f32.vlgmr.msra.gmra.mrb[8].mxu1 %vm213_vm2, %v625_v44 }
 0x3bd   :  { %2302 = vmatprep.mubr.msk.f32.mxu1 %vm2620_vm1, %v2619_v8 }
 0x487   :  { %v461_v45 = vpop.f32.mrb[0].mxu0 }
 0x488   :  { %v2279_v46 = vpop.f32.mrb[1].mxu0  ;;  %2287 = vmatprep.mubr.msk.f32.mxu0 %vm213_vm2, %v461_v45 }
 0x48b   :  { %v537_v47 = vpop.f32.mrb[6].mxu1 }
 0x48c   :  { %v2284_v49 = vpop.f32.mrb[7].mxu1  ;;  %2288 = vmatmul.mubr.msk.f32.vlgmr.msra.gmra.mrb[2].mxu0 %vm213_vm2, %v537_v47 }
 0x48d   :  { %2296 = vmatpush3.xpose.msk.msra.mxu0 %vm213_vm2, %v705_v48  ;;  %2297 = vmatprep.mubr.msk.f32.mxu0 %vm2620_vm1, %v2619_v8  ;;  %v109_v48 = vld [vmem:[%s2996_s3 + $0x10] sm:$0xff] }
 0x48e   :  { %2305 = vmatprep.subr.mxu0 %v2619_v8 }
 0x48f   :  { %v698_v51 = vpop.f32.mrb[8].mxu1 }
 0x490   :  { %v780_v52 = vmul.f32 0.35355338, %v698_v51  ;;  %v2294_v53 = vpop.f32.mrb[9].mxu1  ;;  %2298 = vmatmul.mubr.msk.f32.vlgmr.msra.gmra.mrb[4].mxu0 %vm213_vm2, %v703_v50 }
 0x491   :  { %2307 = vmatprep.mubr.msk.f32.mxu0 %vm2620_vm1, %v2619_v8 }
 0x492   :  { %v782_v54 = vsel %vm213_vm2, %v780_v52, -inf }
 0x493   :  { %783 = vmax.xlane.f32.xlu1 %v782_v54 }
 0x4a4   :  { %804 = vrot.lane.b32.xlu1 %v2780_v12, %s2625_s25 }
 0x4a8   :  { %1039 = vrot.lane.b32.xlu1 %v2780_v12, %s2626_s27 }
 0x4ac   :  { %1119 = vrot.lane.b32.xlu1 %v2783_v13, %s2627_s29 }
 0x4b0   :  { %1117 = vrot.lane.b32.xlu1 %v2783_v13, %s2626_s27 }
 0x520   :  { %v784_v55 = vpop.xlane.xlu1 %783 }
 0x521   :  { %v788_v56 = vsub.f32 %v780_v52, %v784_v55 }
 0x523   :  { %v790_v57 = vmul.f32 1.442695, %v788_v56 }
 0x524   :  { %v805_v58 = vpop.permute.xlu1 %804 }
 0x525   :  { %2463 = vpow2.f32 %v790_v57  ;;  %2301 = vmatpush3.msra.mxu1 %v805_v58 }
 0x526   :  { %2315 = vmatprep.subr.mxu1 %v2619_v8 }
 0x528   :  { %v1040_v2 = vpop.permute.xlu1 %1039 }
 0x52c   :  { %v1120_v9 = vpop.permute.xlu1 %1119 }
 0x52f   :  { %v2464_v59 = vpop.eup %2463 }
 0x530   :  { %v794_v60 = vsel %vm213_vm2, %v2464_v59, 0.0  ;;  %v1118_v10 = vpop.permute.xlu1 %1117 }
 0x531   :  { %795 = vadd.xlane.f32.xlu0 %v794_v60 }
 0x547   :  { %1041 = vrot.lane.b32.xlu0 %v2780_v12, %s2627_s29 }
 0x563   :  { %v776_v61 = vpop.f32.mrb[4].mxu0 }
 0x564   :  { %v781_v62 = vmul.f32 0.35355338, %v776_v61  ;;  %v2299_v63 = vpop.f32.mrb[5].mxu0 }
 0x566   :  { %v785_v0 = vsel %vm213_vm2, %v781_v62, -inf }
 0x567   :  { %786 = vmax.xlane.f32.xlu1 %v785_v0 }
 0x5be   :  { %v796_v1 = vpop.xlane.xlu0 %795 }
 0x5bf   :  { %2465 = vrcp.f32 %v796_v1 }
 0x5c2   :  { %v1042_v6 = vpop.permute.xlu0 %1041 }
 0x5c9   :  { %v2466_v3 = vpop.eup %2465 }
 0x5ca   :  { %v802_v4 = vmul.f32 %v2466_v3, %v2464_v59 }
 0x5cc   :  { %2303 = vmatmul.mubr.msk.f32.vlgmr.msra.gmra.mrb[10].mxu1 %vm213_vm2, %v802_v4 }
 0x5cd   :  { %2316 = vmatpush3.xpose.msk.msra.mxu1 %vm213_vm2, %v1042_v6  ;;  %2317 = vmatprep.mubr.msk.f32.mxu1 %vm2620_vm1, %v2619_v8 }
 0x5ce   :  { %2320 = vmatprep.subr.mxu1 %v2619_v8 }
 0x5d0   :  { %2318 = vmatmul.mubr.msk.f32.vlgmr.msra.gmra.mrb[12].mxu1 %vm213_vm2, %v1040_v2 }
 0x5d1   :  { %2321 = vmatpush3.xpose.msk.msra.mxu1 %vm213_vm2, %v1120_v9  ;;  %2322 = vmatprep.mubr.msk.f32.mxu1 %vm2620_vm1, %v2619_v8 }
 0x5d2   :  { %2330 = vmatprep.subr.mxu1 %v2619_v8 }
 0x5d4   :  { %2323 = vmatmul.mubr.msk.f32.vlgmr.msra.gmra.mrb[14].mxu1 %vm213_vm2, %v1118_v10 }
 0x5d5   :  { %2332 = vmatprep.mubr.msk.f32.mxu1 %vm2620_vm1, %v2619_v8 }
 0x5f4   :  { %v787_v11 = vpop.xlane.xlu1 %786 }
 0x5f5   :  { %v789_v14 = vsub.f32 %v781_v62, %v787_v11 }
 0x5f7   :  { %v792_v15 = vmul.f32 1.442695, %v789_v14 }
 0x5f9   :  { %2467 = vpow2.f32 %v792_v15 }
 0x603   :  { %v2468_v16 = vpop.eup %2467 }
 0x604   :  { %v797_v17 = vsel %vm213_vm2, %v2468_v16, 0.0 }
 0x605   :  { %798 = vadd.xlane.f32.xlu0 %v797_v17 }
 0x61b   :  { %880 = vrot.lane.b32.xlu0 %v2783_v13, %s2625_s25 }
 0x61f   :  { %1295 = vrot.lane.b32.xlu0 %v2783_v13, %s2628_s30 }
 0x623   :  { %1456 = vrot.lane.b32.xlu0 %v2780_v12, %s2629_s12 }
 0x627   :  { %1534 = vrot.lane.b32.xlu0 %v2783_v13, %s2629_s12 }
 0x62b   :  { %1454 = vrot.lane.b32.xlu0 %v2780_v12, %s2630_s6 }
 0x692   :  { %v799_v18 = vpop.xlane.xlu0 %798 }
 0x693   :  { %2469 = vrcp.f32 %v799_v18 }
 0x696   :  { %v881_v19 = vpop.permute.xlu0 %880 }
 0x697   :  { %2306 = vmatpush3.msra.mxu0 %v881_v19 }
 0x698   :  { %2310 = vmatprep.subr.mxu0 %v108_v33 }
 0x69a   :  { %v1296_v20 = vpop.permute.xlu0 %1295 }
 0x69b   :  { %2331 = vmatpush3.msra.mxu1 %v1296_v20 }
 0x69c   :  { %2340 = vmatprep.subr.mxu1 %v2619_v8 }
 0x69d   :  { %v2470_v21 = vpop.eup %2469 }
 0x69e   :  { %v803_v22 = vmul.f32 %v2470_v21, %v2468_v16  ;;  %v1457_v50 = vpop.permute.xlu0 %1456 }
 0x69f   :  { %v876_v23 = vpop.f32.mrb[10].mxu1 }
 0x6a0   :  { %v2304_v24 = vpop.f32.mrb[11].mxu1  ;;  %2308 = vmatmul.mubr.msk.f32.vlgmr.msra.gmra.mrb[6].mxu0 %vm213_vm2, %v803_v22 }
 0x6a1   :  { %2312 = vmatprep.mubr.msk.f32.mxu0 %vm213_vm2, %v876_v23  ;;  %2311 = vmatpush3.msra.mxu0 %v108_v33 }
 0x6a2   :  { %2325 = vmatprep.subr.mxu0 %v2619_v8  ;;  %v1535_v54 = vpop.permute.xlu0 %1534 }
 0x6a3   :  { %v1113_v25 = vpop.f32.mrb[12].mxu1 }
 0x6a4   :  { %v1195_v26 = vmul.f32 0.35355338, %v1113_v25  ;;  %v2319_v27 = vpop.f32.mrb[13].mxu1 }
 0x6a6   :  { %v1197_v28 = vsel %vm213_vm2, %v1195_v26, -inf  ;;  %v1455_v56 = vpop.permute.xlu0 %1454 }
 0x6a7   :  { %1198 = vmax.xlane.f32.xlu1 %v1197_v28  ;;  %v1191_v29 = vpop.f32.mrb[14].mxu1 }
 0x6a8   :  { %v1196_v30 = vmul.f32 0.35355338, %v1191_v29  ;;  %v2324_v31 = vpop.f32.mrb[15].mxu1 }
 0x6a9   :  { %v2149_v31 = vld [vmem:[%s2997_s4] ss:$0 sm:$0xff] }
 0x6aa   :  { %v1200_v32 = vsel %vm213_vm2, %v1196_v30, -inf }
 0x6ab   :  { %1201 = vmax.xlane.f32.xlu1 %v1200_v32 }
 0x734   :  { %v1199_v34 = vpop.xlane.xlu1 %1198 }
 0x735   :  { %v1203_v35 = vsub.f32 %v1195_v26, %v1199_v34 }
 0x737   :  { %v1205_v36 = vmul.f32 1.442695, %v1203_v35 }
 0x738   :  { %v1202_v37 = vpop.xlane.xlu1 %1201 }
 0x739   :  { %2471 = vpow2.f32 %v1205_v36  ;;  %v1204_v38 = vsub.f32 %v1196_v30, %v1202_v37 }
 0x73b   :  { %v1207_v39 = vmul.f32 1.442695, %v1204_v38 }
 0x73d   :  { %2473 = vpow2.f32 %v1207_v39 }
 0x743   :  { %v2472_v40 = vpop.eup %2471 }
 0x744   :  { %v1209_v41 = vsel %vm213_vm2, %v2472_v40, 0.0 }
 0x745   :  { %1210 = vadd.xlane.f32.xlu1 %v1209_v41 }
 0x747   :  { %v2474_v42 = vpop.eup %2473 }
 0x748   :  { %v1212_v43 = vsel %vm213_vm2, %v2474_v42, 0.0 }
 0x749   :  { %1213 = vadd.xlane.f32.xlu1 %v1212_v43 }
 0x75a   :  { %1219 = vrot.lane.b32.xlu1 %v2780_v12, %s2628_s30 }
 0x75e   :  { %1532 = vrot.lane.b32.xlu1 %v2783_v13, %s2630_s6 }
 0x773   :  { %v952_v44 = vpop.f32.mrb[6].mxu0 }
 0x774   :  { %v2309_v45 = vpop.f32.mrb[7].mxu0  ;;  %2313 = vmatmul.mubr.msk.f32.vlgmr.msra.gmra.mrb[2].mxu0 %vm213_vm2, %v952_v44 }
 0x775   :  { %2327 = vmatprep.mubr.msk.f32.mxu0 %vm2620_vm1, %v2619_v8 }
 0x7d2   :  { %v1211_v46 = vpop.xlane.xlu1 %1210 }
 0x7d3   :  { %2475 = vrcp.f32 %v1211_v46 }
 0x7d6   :  { %v1214_v47 = vpop.xlane.xlu1 %1213 }
 0x7d7   :  { %2477 = vrcp.f32 %v1214_v47 }
 0x7da   :  { %v1220_v49 = vpop.permute.xlu1 %1219 }
 0x7db   :  { %2326 = vmatpush3.msra.mxu0 %v1220_v49  ;;  %v1903_v49 = vld [vmem:[%s3000_s7 + $0x8] sm:$0xff] }
 0x7dc   :  { %2335 = vmatprep.subr.mxu0 %v109_v48 }
 0x7dd   :  { %v2476_v51 = vpop.eup %2475 }
 0x7de   :  { %v1217_v52 = vmul.f32 %v2476_v51, %v2472_v40  ;;  %v1533_v61 = vpop.permute.xlu1 %1532  ;;  %v1904_v51 = vld [vmem:[%s3000_s7 + $0x10] sm:$0xff] }
 0x7e0   :  { %2328 = vmatmul.mubr.msk.f32.vlgmr.msra.gmra.mrb[8].mxu0 %vm213_vm2, %v1217_v52  ;;  %v1905_v52 = vld [vmem:[%s3000_s7 + $0x18] sm:$0xff] }
 0x7e1   :  { %v2478_v53 = vpop.eup %2477  ;;  %2336 = vmatpush3.msra.mxu0 %v109_v48 }
 0x7e2   :  { %v1218_v55 = vmul.f32 %v2478_v53, %v2474_v42  ;;  %2345 = vmatprep.subr.mxu0 %v2619_v8  ;;  %v2407_v53 = vpack.c.bf16 %v1905_v52, %v1904_v51 }
 0x7e4   :  { %2333 = vmatmul.mubr.msk.f32.vlgmr.msra.gmra.mrb[16].mxu1 %vm213_vm2, %v1218_v55  ;;  %v1996_v55 = vld [vmem:[%s3002_s9 + $0x8] sm:$0xff] }
 0x7e5   :  { %2341 = vmatpush3.xpose.msk.msra.mxu1 %vm213_vm2, %v1457_v50  ;;  %2342 = vmatprep.mubr.msk.f32.mxu1 %vm2620_vm1, %v2619_v8 }
 0x7e6   :  { %2350 = vmatprep.subr.mxu1 %v2619_v8 }
 0x7e8   :  { %2343 = vmatmul.mubr.msk.f32.vlgmr.msra.gmra.mrb[18].mxu1 %vm213_vm2, %v1455_v56  ;;  %v1997_v56 = vld [vmem:[%s3002_s9 + $0x10] sm:$0xff] }
 0x7e9   :  { %2352 = vmatprep.mubr.msk.f32.mxu1 %vm2620_vm1, %v2619_v8 }
 0x8b3   :  { %v1291_v57 = vpop.f32.mrb[8].mxu0 }
 0x8b4   :  { %v2329_v58 = vpop.f32.mrb[9].mxu0  ;;  %2337 = vmatprep.mubr.msk.f32.mxu0 %vm213_vm2, %v1291_v57 }
 0x8b5   :  { %v1998_v58 = vld [vmem:[%s3002_s9 + $0x18] sm:$0xff] }
 0x8b7   :  { %v1367_v59 = vpop.f32.mrb[16].mxu1 }
 0x8b8   :  { %v2334_v60 = vpop.f32.mrb[17].mxu1  ;;  %2338 = vmatmul.mubr.msk.f32.vlgmr.msra.gmra.mrb[2].mxu0 %vm213_vm2, %v1367_v59  ;;  %v2415_v59 = vpack.c.bf16 %v1998_v58, %v1997_v56 }
 0x8b9   :  { %2346 = vmatpush3.xpose.msk.msra.mxu0 %vm213_vm2, %v1535_v54  ;;  %2347 = vmatprep.mubr.msk.f32.mxu0 %vm2620_vm1, %v2619_v8  ;;  %v1995_v54 = vld [vmem:[%s3002_s9] sm:$0xff] }
 0x8ba   :  { %2355 = vmatprep.subr.mxu0 %v2619_v8  ;;  %v2411_v57 = vpack.c.bf16 %v1996_v55, %v1995_v54  ;;  %v1999_v60 = vld [vmem:[%s3002_s9 + $0x20] sm:$0xff] }
 0x8bb   :  { %v1528_v62 = vpop.f32.mrb[18].mxu1 }
 0x8bc   :  { %v1610_v63 = vmul.f32 0.35355338, %v1528_v62  ;;  %v2344_v0 = vpop.f32.mrb[19].mxu1  ;;  %2348 = vmatmul.mubr.msk.f32.vlgmr.msra.gmra.mrb[10].mxu0 %vm213_vm2, %v1533_v61  ;;  %v2000_v61 = vld [vmem:[%s3002_s9 + $0x28] sm:$0xff] }
 0x8bd   :  { %2357 = vmatprep.mubr.msk.f32.mxu0 %vm2620_vm1, %v2619_v8  ;;  %v2419_v62 = vpack.c.bf16 %v2000_v61, %v1999_v60 }
 0x8be   :  { %v1612_v1 = vsel %vm213_vm2, %v1610_v63, -inf }
 0x8bf   :  { %1613 = vmax.xlane.f32.xlu0 %v1612_v1 }
 0x94c   :  { %v1614_v2 = vpop.xlane.xlu0 %1613 }
 0x94d   :  { %v1618_v3 = vsub.f32 %v1610_v63, %v1614_v2 }
 0x94f   :  { %v1620_v4 = vmul.f32 1.442695, %v1618_v3 }
 0x951   :  { %2479 = vpow2.f32 %v1620_v4 }
 0x95b   :  { %v2480_v6 = vpop.eup %2479 }
 0x95c   :  { %v1624_v9 = vsel %vm213_vm2, %v2480_v6, 0.0 }
 0x95d   :  { %1625 = vadd.xlane.f32.xlu0 %v1624_v9  ;;  %v2955_v9 = vld [vmem:[#allocation5] ss:$0 sm:$0xff] }
 0x98f   :  { %v1606_v10 = vpop.f32.mrb[10].mxu0 }
 0x990   :  { %v1611_v11 = vmul.f32 0.35355338, %v1606_v10  ;;  %v2349_v14 = vpop.f32.mrb[11].mxu0 }
 0x992   :  { %v1615_v15 = vsel %vm213_vm2, %v1611_v11, -inf }
 0x993   :  { %1616 = vmax.xlane.f32.xlu1 %v1615_v15  ;;  %v2145_v15 = vld [vmem:[#allocation7] ss:$0 sm:$0xff] }
 0x9a4   :  { %1634 = vrot.lane.b32.xlu1 %v2780_v12, %s2631_s16  ;;  %v110_v12 = vld [vmem:[%s2996_s3 + $0x18] sm:$0xff] }
 0x9ea   :  { %v1626_v8 = vpop.xlane.xlu0 %1625 }
 0x9eb   :  { %2481 = vrcp.f32 %v1626_v8 }
 0x9f5   :  { %v2482_v17 = vpop.eup %2481 }
 0x9f6   :  { %v1632_v20 = vmul.f32 %v2482_v17, %v2480_v6 }
 0xa20   :  { %v1617_v16 = vpop.xlane.xlu1 %1616 }
 0xa21   :  { %v1619_v18 = vsub.f32 %v1611_v11, %v1617_v16 }
 0xa23   :  { %v1622_v19 = vmul.f32 1.442695, %v1619_v18 }
 0xa24   :  { %v1635_v21 = vpop.permute.xlu1 %1634 }
 0xa25   :  { %2483 = vpow2.f32 %v1622_v19  ;;  %2351 = vmatpush3.msra.mxu1 %v1635_v21  ;;  %v2001_v19 = vld [vmem:[%s3002_s9 + $0x30] sm:$0xff] }
 0xa26   :  { %2353 = vmatmul.mubr.msk.f32.vlgmr.msra.gmra.mrb[20].mxu1 %vm213_vm2, %v1632_v20  ;;  %v2002_v20 = vld [vmem:[%s3002_s9 + $0x38] sm:$0xff]  ;;  %s2632_s9 = smov [#allocation10]  }
 0xa27   :  { %v2423_v21 = vpack.c.bf16 %v2002_v20, %v2001_v19 }
 0xa2f   :  { %v2484_v22 = vpop.eup %2483 }
 0xa30   :  { %v1627_v23 = vsel %vm213_vm2, %v2484_v22, 0.0 }
 0xa31   :  { %1628 = vadd.xlane.f32.xlu0 %v1627_v23 }
 0xa47   :  { %1710 = vrot.lane.b32.xlu0 %v2783_v13, %s2631_s16 }
 0xabe   :  { %v1629_v24 = vpop.xlane.xlu0 %1628 }
 0xabf   :  { %2485 = vrcp.f32 %v1629_v24 }
 0xac2   :  { %v1711_v25 = vpop.permute.xlu0 %1710 }
 0xac3   :  { %2356 = vmatpush3.msra.mxu0 %v1711_v25 }
 0xac4   :  { %2360 = vmatprep.subr.mxu0 %v110_v12 }
 0xac9   :  { %v2486_v26 = vpop.eup %2485 }
 0xaca   :  { %v1633_v27 = vmul.f32 %v2486_v26, %v2484_v22  ;;  %v2182_v22 = vld [vmem:[#allocation8] ss:$0 sm:$0xff] }
 0xacc   :  { %2358 = vmatmul.mubr.msk.f32.vlgmr.msra.gmra.mrb[12].mxu0 %vm213_vm2, %v1633_v27 }
 0xacd   :  { %2361 = vmatpush3.msra.mxu0 %v110_v12 }
 0xace   :  { %2412 = vmatprep.subr.bf16.mxu0 %v2411_v57 }
 0xaf9   :  { %v1706_v28 = vpop.f32.mrb[20].mxu1 }
 0xafa   :  { %v2354_v29 = vpop.f32.mrb[21].mxu1  ;;  %2362 = vmatprep.mubr.msk.f32.mxu0 %vm213_vm2, %v1706_v28  ;;  %v2185_v28 = vld [vmem:[%s3003_s10] ss:$0 sm:$0xff]  ;;  %s2130_s10 = sshll.u32 %s2632_s9, 4  ;;  %s2131_s10 = int_to_ptr.vmem [resolvable:$true] %s2130_s10 }
 0xafb   :  { %s2583_s3 = scalar_lea.vmem %s2131_s10, 256  ;;  %p2588_p5 = scmp.lt.s32.totalorder %s2131_s10, %s2131_s10 }
 0xafc   :  { %p2584_p4 = scmp.ne.s32.totalorder %s2131_s10, %s2583_s3  ;;  %p2589_p6 = scmp.lt.s32.totalorder %s2583_s3, %s2583_s3 }
 0xafe   :  { %p2590_p7 = por %p2589_p6, %p2588_p5 }
 0xb00   :  { %p2591_p8 = pnand %p2590_p7, %p2584_p4 }
 0xb9f   :  { %v1782_v30 = vpop.f32.mrb[12].mxu0 }
 0xba0   :  { %v2359_v13 = vpop.f32.mrb[13].mxu0  ;;  %2363 = vmatmul.mubr.msk.f32.vlgmr.msra.gmra.mrb[2].mxu0 %vm213_vm2, %v1782_v30 }
 0xba1   :  { %2414 = vmatpush3.bf16.msra.mxu0 %v2411_v57 }
 0xba2   :  { %2416 = vmatprep.subr.bf16.mxu0 %v2415_v59 }
 0xba5   :  { %2418 = vmatpush3.bf16.msra.mxu0 %v2415_v59 }
 0xba6   :  { %2420 = vmatprep.subr.bf16.mxu0 %v2419_v62 }
 0xba9   :  { %2422 = vmatpush3.bf16.msra.mxu0 %v2419_v62 }
 0xbaa   :  { %2424 = vmatprep.subr.bf16.mxu0 %v2423_v21 }
 0xbad   :  { %2426 = vmatpush3.bf16.msra.mxu0 %v2423_v21 }
 0xc73   :  { %v2364_v32 = vpop.f32.mrb[2].mxu0 }
 0xc74   :  { %v2427_v33 = vadd.f32 %v2364_v32, %v2149_v31  ;;  %v1858_v34 = vpop.f32.mrb[3].mxu0 }
 0xc75   :  { %v2428_v35 = vadd.f32 %v2149_v31, %v1858_v34 }
 0xc76   :  { %v1870_v36 = vadd.f32 %v2427_v33, %v2767_v7 }
 0xc77   :  { %v1869_v37 = vadd.f32 %v2428_v35, %v2763_v5  ;;  %v1902_v5 = vld [vmem:[%s3000_s7] sm:$0xff] }
 0xc78   :  { %v1874_v38 = vsel %vm121_vm0, %v1870_v36, 0.0  ;;  %v2403_v50 = vpack.c.bf16 %v1903_v49, %v1902_v5 }
 0xc79   :  { %1875 = vadd.xlane.f32.xlu0 %v1874_v38  ;;  %v1871_v39 = vsel %vm121_vm0, %v1869_v37, 0.0 }
 0xc7a   :  { %1872 = vadd.xlane.f32.xlu1 %v1871_v39  ;;  %2404 = vmatprep.subr.bf16.mxu1 %v2403_v50 }
 0xc7b   :  { %2406 = vmatpush3.bf16.msra.mxu1 %v2403_v50 }
 0xc7c   :  { %2408 = vmatprep.subr.bf16.mxu1 %v2407_v53 }
 0xc7f   :  { %2410 = vmatpush3.bf16.msra.mxu1 %v2407_v53 }
 0xd06   :  { %v1876_v40 = vpop.xlane.xlu0 %1875 }
 0xd07   :  { %v1879_v41 = vmul.f32 0.03125, %v1876_v40  ;;  %v1873_v42 = vpop.xlane.xlu1 %1872 }
 0xd08   :  { %v1878_v43 = vmul.f32 0.03125, %v1873_v42 }
 0xd09   :  { %v1881_v44 = vsub.f32 %v1870_v36, %v1879_v41 }
 0xd0a   :  { %v1880_v45 = vsub.f32 %v1869_v37, %v1878_v43 }
 0xd0b   :  { %v1883_v46 = vmul.f32 %v1881_v44, %v1881_v44 }
 0xd0c   :  { %v1882_v47 = vmul.f32 %v1880_v45, %v1880_v45 }
 0xd0d   :  { %v1887_v48 = vsel %vm121_vm0, %v1883_v46, 0.0 }
 0xd0e   :  { %1888 = vadd.xlane.f32.xlu0 %v1887_v48  ;;  %v1884_v7 = vsel %vm121_vm0, %v1882_v47, 0.0 }
 0xd0f   :  { %1885 = vadd.xlane.f32.xlu1 %v1884_v7 }
 0xd9b   :  { %v1889_v63 = vpop.xlane.xlu0 %1888 }
 0xd9c   :  { %v1891_v0 = vmul.f32 0.03125, %v1889_v63  ;;  %v1886_v1 = vpop.xlane.xlu1 %1885 }
 0xd9d   :  { %v1890_v2 = vmul.f32 0.03125, %v1886_v1 }
 0xd9e   :  { %v1893_v3 = vadd.f32 1e-05, %v1891_v0 }
 0xd9f   :  { %v1892_v4 = vadd.f32 1e-05, %v1890_v2 }
 0xda0   :  { %2487 = vrsqrt.f32 %v1893_v3 }
 0xda1   :  { %2489 = vrsqrt.f32 %v1892_v4 }
 0xdaa   :  { %v2488_v6 = vpop.eup %2487 }
 0xdab   :  { %v2490_v10 = vpop.eup %2489  ;;  %v1897_v11 = vmul.f32 %v2488_v6, %v1881_v44 }
 0xdac   :  { %v1896_v14 = vmul.f32 %v2490_v10, %v1880_v45 }
 0xdad   :  { %v1899_v8 = vmul.f32 %v2955_v9, %v1897_v11 }
 0xdae   :  { %v1898_v16 = vmul.f32 %v2955_v9, %v1896_v14 }
 0xdaf   :  { %v1901_v18 = vadd.f32 %v2145_v15, %v1899_v8 }
 0xdb0   :  { %v1900_v17 = vadd.f32 %v2145_v15, %v1898_v16 }
 0xdb2   :  { %2373 = vmatprep.mubr.msk.f32.mxu1 %vm121_vm0, %v1900_v17 }
 0xdb3   :  { %2374 = vmatmul.mubr.msk.f32.vlgmr.msra.gmra.mrb[22].mxu1 %vm121_vm0, %v1901_v18 }
 0xe86   :  { %v2375_v23 = vpop.f32.mrb[22].mxu1 }
 0xe87   :  { %v1990_v24 = vadd.f32 %v2375_v23, %v2182_v22  ;;  %v1984_v12 = vpop.f32.mrb[23].mxu1 }
 0xe88   :  { %v1985_v25 = vadd.f32 %v2182_v22, %v1984_v12 }
 0xe89   :  { %v1994_v27 = vmax.f32 %v1990_v24, 0.0 }
 0xe8a   :  { %v1993_v26 = vmax.f32 %v1985_v25, 0.0 }
 0xe8c   :  { %2392 = vmatprep.mubr.msk.f32.mxu0 %vm2009_vm3, %v1993_v26 }
 0xe8d   :  { %2393 = vmatmul.mubr.msk.f32.vlgmr.msra.gmra.mrb[14].mxu0 %vm2009_vm3, %v1994_v27 }
 0xf60   :  { %v2394_v29 = vpop.f32.mrb[14].mxu0 }
 0xf61   :  { %v2088_v30 = vadd.f32 %v2394_v29, %v2185_v28  ;;  %v2082_v13 = vpop.f32.mrb[15].mxu0 }
 0xf62   :  { %v2083_v31 = vadd.f32 %v2185_v28, %v2082_v13 }
 0xf63   :  { %v2092_v32 = vadd.f32 %v2088_v30, %v1901_v18 }
 0xf64   :  { %v2091_v33 = vadd.f32 %v2083_v31, %v1900_v17 }
 0xf65   :  { %v2096_v34 = vsel %vm121_vm0, %v2092_v32, 0.0 }
 0xf66   :  { %2097 = vadd.xlane.f32.xlu0 %v2096_v34  ;;  %v2093_v35 = vsel %vm121_vm0, %v2091_v33, 0.0 }
 0xf67   :  { %2094 = vadd.xlane.f32.xlu1 %v2093_v35 }
 0xff3   :  { %v2098_v36 = vpop.xlane.xlu0 %2097 }
 0xff4   :  { %v2100_v37 = vmul.f32 0.03125, %v2098_v36  ;;  %v2095_v38 = vpop.xlane.xlu1 %2094 }
 0xff5   :  { %v2099_v39 = vmul.f32 0.03125, %v2095_v38 }
 0xff6   :  { %v2102_v40 = vsub.f32 %v2092_v32, %v2100_v37 }
 0xff7   :  { %v2101_v41 = vsub.f32 %v2091_v33, %v2099_v39 }
 0xff8   :  { %v2104_v42 = vmul.f32 %v2102_v40, %v2102_v40 }
 0xff9   :  { %v2103_v43 = vmul.f32 %v2101_v41, %v2101_v41 }
 0xffa   :  { %v2108_v44 = vsel %vm121_vm0, %v2104_v42, 0.0 }
 0xffb   :  { %2109 = vadd.xlane.f32.xlu0 %v2108_v44  ;;  %v2105_v45 = vsel %vm121_vm0, %v2103_v43, 0.0 }
 0xffc   :  { %2106 = vadd.xlane.f32.xlu1 %v2105_v45 }
0x1088   :  { %v2110_v46 = vpop.xlane.xlu0 %2109 }
0x1089   :  { %v2112_v47 = vmul.f32 0.03125, %v2110_v46  ;;  %v2107_v48 = vpop.xlane.xlu1 %2106 }
0x108a   :  { %v2111_v7 = vmul.f32 0.03125, %v2107_v48 }
0x108b   :  { %v2114_v5 = vadd.f32 1e-05, %v2112_v47 }
0x108c   :  { %v2113_v49 = vadd.f32 1e-05, %v2111_v7 }
0x108d   :  { %2491 = vrsqrt.f32 %v2114_v5 }
0x108e   :  { %2493 = vrsqrt.f32 %v2113_v49 }
0x1097   :  { %v2492_v50 = vpop.eup %2491 }
0x1098   :  { %v2494_v51 = vpop.eup %2493  ;;  %v2118_v52 = vmul.f32 %v2492_v50, %v2102_v40 }
0x1099   :  { %v2117_v53 = vmul.f32 %v2494_v51, %v2101_v41 }
0x109a   :  { %v2120_v54 = vmul.f32 %v2955_v9, %v2118_v52 }
0x109b   :  { %v2119_v55 = vmul.f32 %v2955_v9, %v2117_v53 }
0x109c   :  { %v2122_v56 = vadd.f32 %v2145_v15, %v2120_v54 }
0x109d   :  { %v2121_v57 = vadd.f32 %v2145_v15, %v2119_v55 }
0x109e   :  { %2124 = vst.msk [vmem:[#allocation10 + $0x8] sm:$0xff] %vm121_vm0, %v2122_v56 }
0x109f   :  { %2123 = vst.msk [vmem:[#allocation10] sm:$0xff] %vm121_vm0, %v2121_v57 }
0x10a0   :  { %2594 = shalt.err (!%p2591_p8)
}
0x10a1   :  { %s2595_s17 = scalar_lea.hbm %s3004_s11, 256 }
0x10a2   :  { %p2596_p9 = scmp.ne.s32.totalorder %s3004_s11, %s2595_s17  ;;  %p2599_p10 = scmp.lt.u32.totalorder %s2595_s17, %s3004_s11 }
0x10a4   :  { %p2601_p11 = pnand %p2599_p10, %p2596_p9 }
0x10a6   :  { %2604 = shalt.err (!%p2601_p11)
}
0x10a7   :  { %2136 = dma.vmem_to_hbm [thread:$0]  %s2131_s10, 256, %s3004_s11, [#allocation4], %s2615_s5, %s2615_s5, %s2616_s18  }
0x10a8   :  { %2611 = dma.done.wait [#allocation4], 256  }
0x10a9   :  { %2612 = vsyncadd [#allocation4], 4294967040 }
0x10aa   :  { %2140 = vsyncpa [#allocation3], 1 }
0x10ab   :  { %2141 = vsyncpa [#allocation6], 1 }
0x10ac   :  { %2142 = vsyncpa [#allocation9], 1 }
0x10ad   :  { %2143 = vsyncpa [#allocation4], 1 }

</bundles_post_ra>
